<compile_context>
chip_gen: v7x
topology: tpu7x:2x2x1
jax: 0.10.0
libtpu: 0.0.40
codegen_flags: <defaults>
</compile_context>

<pallas_src>
import functools

import jax
import jax.numpy as jnp
from jax import lax
from jax.experimental import pallas as pl
from jax.experimental.pallas import tpu as pltpu


def _round_up(x: int, m: int) -> int:
    return ((x + m - 1) // m) * m


def _rmsnorm_kernel(x_ref, g_ref, o_ref, *, eps: float):
    # x_ref : VMEM (T, D)  input rows for this grid step
    # g_ref : VMEM (1, D)  scale vector (same block every step -> resident)
    # o_ref : VMEM (T, D)  output rows (one unmasked full-tile store)
    x = x_ref[...].astype(jnp.float32)                    # (T, D)
    g = g_ref[...].astype(jnp.float32)                    # (1, D), broadcasts
    ms = jnp.mean(x * x, axis=-1, keepdims=True)          # (T, 1)  XLU reduce
    inv = lax.rsqrt(ms + jnp.float32(eps))                # EUP rsqrt
    o_ref[...] = (x * inv * g).astype(o_ref.dtype)


@functools.partial(jax.jit, static_argnames=("eps", "block_rows"))
def rmsnorm_forward(x, gi, *, eps: float = 1e-5, block_rows: int = 256):
    """Pallas TPU equivalent of RMSNorm.forward."""
    orig_shape = x.shape
    orig_dtype = x.dtype
    D = x.shape[-1]

    x2 = x.reshape(-1, D)
    N = x2.shape[0]

    # Tile rows: multiple of 8 (sublane) or the full (padded) extent.
    T = min(block_rows, _round_up(N, 8))
    N_pad = _round_up(N, T)
    if N_pad != N:
        x2 = jnp.pad(x2, ((0, N_pad - N), (0, 0)))  # padded rows are harmless

    grid = (N_pad // T,)

    out = pl.pallas_call(
        functools.partial(_rmsnorm_kernel, eps=eps),
        out_shape=jax.ShapeDtypeStruct((N_pad, D), orig_dtype),
        grid_spec=pl.GridSpec(
            grid=grid,
            in_specs=[
                pl.BlockSpec((T, D), lambda i: (i, 0)),   # x row tile
                pl.BlockSpec((1, D), lambda i: (0, 0)),   # gi, resident
            ],
            out_specs=pl.BlockSpec((T, D), lambda i: (i, 0)),
        ),
        compiler_params=pltpu.CompilerParams(
            # Row tiles are independent -> shard across both TCs on v7x.
            dimension_semantics=("parallel",),
        ),
    )(x2, gi.reshape(1, D))

    return out[:N].reshape(orig_shape)


def rmsnorm_ref(x, gi, eps):
    """Pure-JAX reference (mirrors the PyTorch module)."""
    in_dtype = x.dtype
    xf = x.astype(jnp.float32)
    ms = jnp.mean(xf * xf, axis=-1, keepdims=True)
    rms = jnp.sqrt(ms + eps)
    return (xf / rms * gi.astype(jnp.float32)).astype(in_dtype)


if __name__ == "__main__":
    key = jax.random.PRNGKey(0)
    k_x, k_g = jax.random.split(key)

    batch, seq, d_model = 2, 8, 128
    eps = 1e-5

    x = jax.random.normal(k_x, (batch, seq, d_model), dtype=jnp.float32)
    # The module initializes gi to ones; use non-trivial values to exercise the scale.
    gi = 1.0 + 0.1 * jax.random.normal(k_g, (d_model,), dtype=jnp.float32)

    # float32 path
    out = rmsnorm_forward(x, gi, eps=eps)
    out = jax.block_until_ready(out)
    ref = rmsnorm_ref(x, gi, eps)
    assert out.shape == x.shape and out.dtype == x.dtype
    assert jnp.allclose(out, ref, atol=1e-5, rtol=1e-5)

    # bfloat16 path (compute still in f32, cast back — matches the module)
    x_bf = x.astype(jnp.bfloat16)
    out_bf = jax.block_until_ready(rmsnorm_forward(x_bf, gi, eps=eps))
    ref_bf = rmsnorm_ref(x_bf, gi, eps)
    assert out_bf.dtype == jnp.bfloat16
    assert jnp.allclose(out_bf.astype(jnp.float32), ref_bf.astype(jnp.float32),
                        atol=2e-2, rtol=2e-2)

    print("KERNEL_OK")
</pallas_src>

<mosaic_0001>
module attributes {stable_mosaic.version = 11 : i64} {
  func.func @_rmsnorm_kernel(%arg0: i32, %arg1: memref<16x128xf32, #tpu.memory_space<vmem>>, %arg2: memref<1x128xf32, #tpu.memory_space<vmem>>, %arg3: memref<16x128xf32, #tpu.memory_space<vmem>>) attributes {dimension_semantics = [#tpu.dimension_semantics<parallel>], iteration_bounds = array<i64: 1>, scalar_prefetch = 0 : i64, scratch_operands = 0 : i64, tpu.core_type = #tpu.core_type<tc>, window_params = [{transform_indices = @transform_0, window_bounds = array<i64: 16, 128>}, {pipeline_mode = #tpu.pipeline_mode<synchronous>, transform_indices = @transform_1, window_bounds = array<i64: 1, 128>}, {transform_indices = @transform_2, window_bounds = array<i64: 16, 128>}]} {
    %c0 = arith.constant 0 : index
    %c0_0 = arith.constant 0 : index
    %0 = vector.load %arg1[%c0, %c0_0] : memref<16x128xf32, #tpu.memory_space<vmem>>, vector<16x128xf32>
    %c0_1 = arith.constant 0 : index
    %c0_2 = arith.constant 0 : index
    %1 = vector.load %arg2[%c0_1, %c0_2] : memref<1x128xf32, #tpu.memory_space<vmem>>, vector<1x128xf32>
    %2 = arith.mulf %0, %0 : vector<16x128xf32>
    %cst = arith.constant dense<0.000000e+00> : vector<16xf32>
    %3 = vector.multi_reduction <add>, %2, %cst [1] : vector<16x128xf32> to vector<16xf32>
    %4 = vector.shape_cast %3 : vector<16xf32> to vector<16x1xf32>
    %cst_3 = arith.constant 1.280000e+02 : f32
    %5 = vector.broadcast %cst_3 : f32 to vector<16x1xf32>
    %6 = arith.divf %4, %5 : vector<16x1xf32>
    %cst_4 = arith.constant 9.99999974E-6 : f32
    %7 = vector.broadcast %cst_4 : f32 to vector<16x1xf32>
    %8 = arith.addf %6, %7 : vector<16x1xf32>
    %9 = math.rsqrt %8 : vector<16x1xf32>
    %10 = vector.broadcast %9 : vector<16x1xf32> to vector<16x128xf32>
    %11 = arith.mulf %0, %10 : vector<16x128xf32>
    %12 = vector.broadcast %1 : vector<1x128xf32> to vector<16x128xf32>
    %13 = arith.mulf %11, %12 : vector<16x128xf32>
    %c0_5 = arith.constant 0 : index
    %c0_6 = arith.constant 0 : index
    %14 = vector.load %arg3[%c0_5, %c0_6] : memref<16x128xf32, #tpu.memory_space<vmem>>, vector<16x128xf32>
    tpu.vector_store %arg3[%c0_5, %c0_6], %13 {strides = array<i32>} : memref<16x128xf32, #tpu.memory_space<vmem>>, vector<16x128xf32>,
    return
  }
  func.func @transform_0(%arg0: i32) -> (i32, i32) {
    %c0_i32 = arith.constant 0 : i32
    %c0_i32_0 = arith.constant 0 : i32
    return %arg0, %c0_i32 : i32, i32
  }
  func.func @transform_1(%arg0: i32) -> (i32, i32) {
    %c0_i32 = arith.constant 0 : i32
    %c0_i32_0 = arith.constant 0 : i32
    %c0_i32_1 = arith.constant 0 : i32
    return %c0_i32, %c0_i32_0 : i32, i32
  }
  func.func @transform_2(%arg0: i32) -> (i32, i32) {
    %c0_i32 = arith.constant 0 : i32
    %c0_i32_0 = arith.constant 0 : i32
    return %arg0, %c0_i32 : i32, i32
  }
}

</mosaic_0001>

<bundles_post_ra>
// kernel: rmsnorm_forward.1
= control target key start
LH: loop header
LB: loop body
LE: loop exit
PB: predicated region body
PF: predicated region fallthrough
CT: control target
= control target key end

     0   :  { %7 = vsyncpa [#allocation3], 0  ;;  %s180_s0 = inlined_call_operand.hbm [shape: f32[16,128], index: 0, kind: input, shape index: {}]   ;;  %s181_s1 = inlined_call_operand.vmem [shape: f32[1,128], index: 1, kind: input, shape index: {}]   ;;  %s182_s2 = inlined_call_operand.hbm [shape: f32[16,128], index: 2, kind: output, shape index: {}]  }
   0x1   :  { %8 = vsyncpa [#allocation4], 0  ;;  %s128_s9 = smov [#allocation2]   ;;  %s80_s13 = scalar_lea.hbm %s180_s0, 256 }
   0x2   :  { %s14_s10 = sshll.u32 %s128_s9, 4  ;;  %p81_p0 = scmp.ne.s32.totalorder %s180_s0, %s80_s13  ;;  %s15_s10 = int_to_ptr.vmem [resolvable:$true] %s14_s10 }
   0x3   :  { %p84_p1 = scmp.lt.u32.totalorder %s80_s13, %s180_s0 }
   0x5   :  { %p86_p2 = pnand %p84_p1, %p81_p0 }
   0x7   :  { %89 = shalt.err (!%p86_p2)
}
   0x8   :  { %s90_s18 = scalar_lea.vmem %s15_s10, 256  ;;  %p95_p4 = scmp.lt.s32.totalorder %s15_s10, %s15_s10 }
   0x9   :  { %p91_p3 = scmp.ne.s32.totalorder %s15_s10, %s90_s18  ;;  %p96_p5 = scmp.lt.s32.totalorder %s90_s18, %s90_s18 }
   0xb   :  { %p97_p6 = por %p96_p5, %p95_p4 }
   0xd   :  { %p98_p7 = pnand %p97_p6, %p91_p3 }
   0xf   :  { %101 = shalt.err (!%p98_p7)
}
  0x10   :  { %s129_s19 = smov 128   ;;  %s130_s20 = smov 8  }
  0x11   :  { %20 = dma.hbm_to_vmem [thread:$0]  %s180_s0, 256, %s15_s10, [#allocation3], %s129_s19, %s129_s19, %s130_s20  }
  0x12   :  { %124 = dma.done.wait [#allocation3], 256  }
  0x13   :  { %125 = vsyncadd [#allocation3], 4294967040  ;;  %v26_v0 = vld [vmem:[#allocation2] sm:$0xff]  ;;  %v27_v1 = vld [vmem:[#allocation2 + $0x8] sm:$0xff]  ;;  %s131_s0 = smov [#allocation5]  }
  0x14   :  { %v29_v2 = vmul.f32 %v26_v0, %v26_v0  ;;  %v30_v3 = vmul.f32 %v27_v1, %v27_v1  ;;  %v71_v11 = vld [vmem:[%s181_s1] ss:$0 sm:$0xff]  ;;  %s59_s25 = sshll.u32 %s131_s0, 4  ;;  %s60_s25 = int_to_ptr.vmem [resolvable:$true] %s59_s25 }
  0x15   :  { %s102_s26 = scalar_lea.vmem %s60_s25, 256  ;;  %p107_p9 = scmp.lt.s32.totalorder %s60_s25, %s60_s25 }
  0x16   :  { %31 = vadd.xlane.f32.xlu0 %v29_v2  ;;  %p103_p8 = scmp.ne.s32.totalorder %s60_s25, %s102_s26  ;;  %p108_p10 = scmp.lt.s32.totalorder %s102_s26, %s102_s26 }
  0x18   :  { %p109_p11 = por %p108_p10, %p107_p9 }
  0x1a   :  { %33 = vadd.xlane.f32.xlu0 %v30_v3  ;;  %p110_p12 = pnand %p109_p11, %p103_p8 }
  0xa3   :  { %v32_v4 = vpop.xlane.xlu0 %31 }
  0xa4   :  { %v36_v5 = vmul.f32 0.0078125, %v32_v4 }
  0xa6   :  { %v38_v6 = vadd.f32 1e-05, %v36_v5 }
  0xa7   :  { %v34_v7 = vpop.xlane.xlu0 %33 }
  0xa8   :  { %76 = vrsqrt.f32 %v38_v6  ;;  %v37_v8 = vmul.f32 0.0078125, %v34_v7 }
  0xaa   :  { %v39_v9 = vadd.f32 1e-05, %v37_v8 }
  0xac   :  { %78 = vrsqrt.f32 %v39_v9 }
  0xb2   :  { %v77_v10 = vpop.eup %76 }
  0xb3   :  { %v42_v12 = vmul.f32 %v77_v10, %v26_v0 }
  0xb5   :  { %v50_v13 = vmul.f32 %v71_v11, %v42_v12 }
  0xb6   :  { %v79_v14 = vpop.eup %78 }
  0xb7   :  { %v43_v15 = vmul.f32 %v79_v14, %v27_v1  ;;  %52 = vst [vmem:[#allocation5] sm:$0xff] %v50_v13 }
  0xb9   :  { %v51_v16 = vmul.f32 %v71_v11, %v43_v15 }
  0xbb   :  { %53 = vst [vmem:[#allocation5 + $0x8] sm:$0xff] %v51_v16 }
  0xbc   :  { %113 = shalt.err (!%p110_p12)
}
  0xbd   :  { %s114_s1 = scalar_lea.hbm %s182_s2, 256 }
  0xbe   :  { %p115_p13 = scmp.ne.s32.totalorder %s182_s2, %s114_s1  ;;  %p118_p0 = scmp.lt.u32.totalorder %s114_s1, %s182_s2 }
  0xc0   :  { %p120_p1 = pnand %p118_p0, %p115_p13 }
  0xc2   :  { %123 = shalt.err (!%p120_p1)
}
  0xc3   :  { %65 = dma.vmem_to_hbm [thread:$0]  %s60_s25, 256, %s182_s2, [#allocation4], %s129_s19, %s129_s19, %s130_s20  }
  0xc4   :  { %126 = dma.done.wait [#allocation4], 256  }
  0xc5   :  { %127 = vsyncadd [#allocation4], 4294967040 }
  0xc6   :  { %69 = vsyncpa [#allocation3], 1 }
  0xc7   :  { %70 = vsyncpa [#allocation4], 1 }

</bundles_post_ra>
